<compile_context>
chip_gen: v5e
topology: v5e:2x2
jax: 0.10.0
libtpu: 0.0.40
codegen_flags: <defaults>
</compile_context>

<pallas_src>
import functools

import jax
import jax.numpy as jnp
from jax.experimental import pallas as pl
from jax.experimental.pallas import tpu as pltpu

HEAD_PAD = 128     # padded fused-head output width (lane-dense output slab)
HIDDEN_PAD = 128   # fc1/fc2 padded to a full lane width
NEG_INF = -1e30    # finite "-inf" for masking padded logit columns


def _round_up(n, m):
    return ((n + m - 1) // m) * m


def _pick_batch_tile(B, batch_tile, min_steps):
    """Batch tile: multiple of 16 sublanes (bf16 packing), nearly-full last
    block, and at least `min_steps` grid steps for large B (v7x 2-TC split)."""
    sub = 16
    if B <= sub:
        return max(8, _round_up(B, 8))
    steps = max(min_steps, pl.cdiv(B, batch_tile))
    tb = _round_up(pl.cdiv(B, steps), sub)
    return min(tb, _round_up(B, sub))


def actor_critic_kernel(x_ref, w1_ref, b1_ref, w2_ref, b2_ref, wh_ref, bh_ref,
                        out_ref, *, output_dim, compute_dtype):
    # fc1 + ReLU (matmul operands in compute_dtype, accumulate/elementwise f32)
    x = x_ref[...]
    if x.dtype != compute_dtype:
        x = x.astype(compute_dtype)
    h1 = jnp.dot(x, w1_ref[...], preferred_element_type=jnp.float32) + b1_ref[...]
    h1 = jnp.maximum(h1, 0.0)

    # fc2 + ReLU
    h2 = jnp.dot(h1.astype(compute_dtype), w2_ref[...],
                 preferred_element_type=jnp.float32) + b2_ref[...]
    h2 = jnp.maximum(h2, 0.0)

    # Fused head: [tb, HEAD_PAD]; cols [0:output_dim] = pi logits,
    # col output_dim = value, remaining columns zero-weight padding.
    head = jnp.dot(h2.astype(compute_dtype), wh_ref[...],
                   preferred_element_type=jnp.float32) + bh_ref[...]

    cols = jax.lax.broadcasted_iota(jnp.int32, head.shape, dimension=1)

    # Masked softmax over the real policy columns only (exact reciprocal:
    # kernel is mem-bound, EUP/VPU slack makes it free, rows sum to 1).
    logits = jnp.where(cols < output_dim, head, NEG_INF)
    m = jnp.max(logits, axis=-1, keepdims=True)
    e = jnp.exp(logits - m)                       # padded cols underflow to 0
    denom = jnp.sum(e, axis=-1, keepdims=True)
    pi = e * pl.reciprocal(denom, approx=False)

    # Lane-dense output slab: pi in [0:output_dim], raw value in col
    # output_dim, zeros elsewhere. One unmasked 128-wide store.
    out = jnp.where(cols == output_dim, head, pi)
    out_ref[...] = out.astype(out_ref.dtype)


def pack_params(params, *, input_dim, output_dim, param_dtype=jnp.float32):
    """Pad / fuse per-layer params into kernel-friendly tiles.

    Returns (w1[in_dim, fc1p], b1[1, fc1p], w2[fc1p, fc2p], b2[1, fc2p],
             wh[fc2p, HEAD_PAD], bh[1, HEAD_PAD]).
    Matmul weights cast to param_dtype (e.g. bf16); biases stay f32.
    Hidden dims are zero-padded to HIDDEN_PAD (inert under ReLU).
    """
    w1, b1, w2, b2, wpi, bpi, wv, bv = params
    fc1 = w1.shape[1]
    fc2 = w2.shape[1]
    fc1p = _round_up(fc1, HIDDEN_PAD)
    fc2p = _round_up(fc2, HIDDEN_PAD)

    w1p = jnp.zeros((input_dim, fc1p), param_dtype).at[:, :fc1].set(
        w1.astype(param_dtype))
    b1p = jnp.zeros((1, fc1p), jnp.float32).at[:, :fc1].set(
        b1.astype(jnp.float32))

    w2p = jnp.zeros((fc1p, fc2p), param_dtype).at[:fc1, :fc2].set(
        w2.astype(param_dtype))
    b2p = jnp.zeros((1, fc2p), jnp.float32).at[:, :fc2].set(
        b2.astype(jnp.float32))

    whp = jnp.zeros((fc2p, HEAD_PAD), param_dtype)
    whp = whp.at[:fc2, :output_dim].set(wpi.astype(param_dtype))
    whp = whp.at[:fc2, output_dim:output_dim + 1].set(wv.astype(param_dtype))

    bhp = jnp.zeros((1, HEAD_PAD), jnp.float32)
    bhp = bhp.at[:, :output_dim].set(bpi.astype(jnp.float32))
    bhp = bhp.at[:, output_dim:output_dim + 1].set(bv.astype(jnp.float32))

    return (w1p, b1p, w2p, b2p, whp, bhp)


def actor_critic_forward(x, packed, *, output_dim,
                         compute_dtype=jnp.float32, out_dtype=jnp.float32,
                         batch_tile=1024, min_grid_steps=2):
    """x: [B, input_dim] (f32 or bf16). Returns (pi: [B, output_dim], v: [B, 1])."""
    w1, b1, w2, b2, wh, bh = packed
    B, in_dim = x.shape
    assert w1.shape[0] == in_dim
    fc1p = w1.shape[1]
    fc2p = w2.shape[0]
    head_pad = wh.shape[1]

    tb = _pick_batch_tile(B, batch_tile, min_grid_steps)
    grid = (pl.cdiv(B, tb),)

    kernel = functools.partial(actor_critic_kernel,
                               output_dim=output_dim,
                               compute_dtype=compute_dtype)

    out = pl.pallas_call(
        kernel,
        out_shape=jax.ShapeDtypeStruct((B, head_pad), out_dtype),
        grid=grid,
        in_specs=[
            # x tile: unpadded feature width (last dim == full array dim is legal).
            pl.BlockSpec((tb, in_dim), lambda i: (i, 0)),
            # weights / biases: VMEM-resident (constant block index -> no refetch).
            pl.BlockSpec((in_dim, fc1p), lambda i: (0, 0)),
            pl.BlockSpec((1, fc1p), lambda i: (0, 0)),
            pl.BlockSpec((fc1p, fc2p), lambda i: (0, 0)),
            pl.BlockSpec((1, fc2p), lambda i: (0, 0)),
            pl.BlockSpec((fc2p, head_pad), lambda i: (0, 0)),
            pl.BlockSpec((1, head_pad), lambda i: (0, 0)),
        ],
        out_specs=pl.BlockSpec((tb, head_pad), lambda i: (i, 0)),
        compiler_params=pltpu.CompilerParams(
            dimension_semantics=("parallel",),   # batch rows independent
            vmem_limit_bytes=32 * 1024 * 1024,   # safe on v5e/v6e/v7x
        ),
    )(x, w1, b1, w2, b2, wh, bh)

    pi = out[:, :output_dim]
    v = out[:, output_dim:output_dim + 1]
    return pi, v


def init_params(key, input_dim, output_dim, fc1_dim, fc2_dim):
    """Deterministic synthetic init (PyTorch-style uniform fan-in bound)."""
    ks = jax.random.split(key, 8)

    def linear(kw, kb, fan_in, fan_out):
        bound = 1.0 / jnp.sqrt(fan_in)
        # stored as [in, out] (transposed vs. torch's [out, in])
        w = jax.random.uniform(kw, (fan_in, fan_out), jnp.float32, -bound, bound)
        b = jax.random.uniform(kb, (1, fan_out), jnp.float32, -bound, bound)
        return w, b

    w1, b1 = linear(ks[0], ks[1], input_dim, fc1_dim)
    w2, b2 = linear(ks[2], ks[3], fc1_dim, fc2_dim)
    wpi, bpi = linear(ks[4], ks[5], fc2_dim, output_dim)
    wv, bv = linear(ks[6], ks[7], fc2_dim, 1)
    return (w1, b1, w2, b2, wpi, bpi, wv, bv)


def reference_forward(x, params):
    w1, b1, w2, b2, wpi, bpi, wv, bv = params
    h1 = jnp.maximum(x @ w1 + b1, 0.0)
    h2 = jnp.maximum(h1 @ w2 + b2, 0.0)
    pi = jax.nn.softmax(h2 @ wpi + bpi, axis=-1)
    v = h2 @ wv + bv
    return pi, v


if __name__ == "__main__":
    # Connect-Four-like dims: flattened 6x7 board -> 7 actions.
    batch = 8
    input_dim = 42
    output_dim = 7
    fc1_dim = 64
    fc2_dim = 64

    key = jax.random.PRNGKey(0)
    k_params, k_x = jax.random.split(key)
    params = init_params(k_params, input_dim, output_dim, fc1_dim, fc2_dim)
    x = jax.random.normal(k_x, (batch, input_dim), jnp.float32)

    pi_ref, v_ref = reference_forward(x, params)

    # --- f32 matmul-operand path (tight tolerances, exact reciprocal) ---
    packed_f32 = pack_params(params, input_dim=input_dim, output_dim=output_dim)
    pi, v = actor_critic_forward(x, packed_f32, output_dim=output_dim)
    pi, v = jax.block_until_ready((pi, v))
    assert pi.shape == (batch, output_dim) and v.shape == (batch, 1)
    assert jnp.allclose(pi, pi_ref, atol=1e-4, rtol=1e-4)
    assert jnp.allclose(v, v_ref, atol=1e-4, rtol=1e-4)
    assert jnp.allclose(jnp.sum(pi, axis=-1), 1.0, atol=1e-4)

    # --- bf16 path (production / large-batch config): bf16 x DMA, bf16
    #     weights, bf16 output slab; elementwise math stays f32 in-kernel. ---
    packed_bf16 = pack_params(params, input_dim=input_dim, output_dim=output_dim,
                              param_dtype=jnp.bfloat16)
    x_bf16 = x.astype(jnp.bfloat16)   # board encodings {-1,0,1} exact in bf16
    pi16, v16 = actor_critic_forward(x_bf16, packed_bf16, output_dim=output_dim,
                                     compute_dtype=jnp.bfloat16,
                                     out_dtype=jnp.bfloat16)
    pi16 = pi16.astype(jnp.float32)
    v16 = v16.astype(jnp.float32)
    pi16, v16 = jax.block_until_ready((pi16, v16))
    assert pi16.shape == (batch, output_dim) and v16.shape == (batch, 1)
    assert jnp.allclose(pi16, pi_ref, atol=0.1)
    assert jnp.allclose(v16, v_ref, atol=0.1)
    assert jnp.allclose(jnp.sum(pi16, axis=-1), 1.0, atol=5e-2)

    print("KERNEL_OK")
</pallas_src>

<mosaic_0001>
module attributes {stable_mosaic.version = 11 : i64} {
  func.func @actor_critic_kernel(%arg0: i32, %arg1: memref<8x42xf32, #tpu.memory_space<vmem>>, %arg2: memref<42x128xf32, #tpu.memory_space<vmem>>, %arg3: memref<1x128xf32, #tpu.memory_space<vmem>>, %arg4: memref<128x128xf32, #tpu.memory_space<vmem>>, %arg5: memref<1x128xf32, #tpu.memory_space<vmem>>, %arg6: memref<128x128xf32, #tpu.memory_space<vmem>>, %arg7: memref<1x128xf32, #tpu.memory_space<vmem>>, %arg8: memref<8x128xf32, #tpu.memory_space<vmem>>) attributes {dimension_semantics = [#tpu.dimension_semantics<parallel>], iteration_bounds = array<i64: 1>, scalar_prefetch = 0 : i64, scratch_operands = 0 : i64, tpu.core_type = #tpu.core_type<tc>, window_params = [{transform_indices = @transform_0, window_bounds = array<i64: 8, 42>}, {pipeline_mode = #tpu.pipeline_mode<synchronous>, transform_indices = @transform_1, window_bounds = array<i64: 42, 128>}, {pipeline_mode = #tpu.pipeline_mode<synchronous>, transform_indices = @transform_2, window_bounds = array<i64: 1, 128>}, {pipeline_mode = #tpu.pipeline_mode<synchronous>, transform_indices = @transform_3, window_bounds = array<i64: 128, 128>}, {pipeline_mode = #tpu.pipeline_mode<synchronous>, transform_indices = @transform_4, window_bounds = array<i64: 1, 128>}, {pipeline_mode = #tpu.pipeline_mode<synchronous>, transform_indices = @transform_5, window_bounds = array<i64: 128, 128>}, {pipeline_mode = #tpu.pipeline_mode<synchronous>, transform_indices = @transform_6, window_bounds = array<i64: 1, 128>}, {transform_indices = @transform_7, window_bounds = array<i64: 8, 128>}]} {
    %c0 = arith.constant 0 : index
    %c0_0 = arith.constant 0 : index
    %0 = vector.load %arg1[%c0, %c0_0] : memref<8x42xf32, #tpu.memory_space<vmem>>, vector<8x42xf32>
    %c0_1 = arith.constant 0 : index
    %c0_2 = arith.constant 0 : index
    %1 = vector.load %arg2[%c0_1, %c0_2] : memref<42x128xf32, #tpu.memory_space<vmem>>, vector<42x128xf32>
    %cst = arith.constant dense<0.000000e+00> : vector<8x128xf32>
    %2 = tpu.matmul %0, %1, %cst {dimension_numbers = #tpu.dot_dimension_numbers<[1], [0], [0], [1], [0, 0, 1, 1], [], []>} : vector<8x42xf32>, vector<42x128xf32>, vector<8x128xf32> -> vector<8x128xf32>
    %c0_3 = arith.constant 0 : index
    %c0_4 = arith.constant 0 : index
    %3 = vector.load %arg3[%c0_3, %c0_4] : memref<1x128xf32, #tpu.memory_space<vmem>>, vector<1x128xf32>
    %4 = vector.broadcast %3 : vector<1x128xf32> to vector<8x128xf32>
    %5 = arith.addf %2, %4 : vector<8x128xf32>
    %cst_5 = arith.constant 0.000000e+00 : f32
    %6 = vector.broadcast %cst_5 : f32 to vector<8x128xf32>
    %7 = arith.maximumf %5, %6 : vector<8x128xf32>
    %c0_6 = arith.constant 0 : index
    %c0_7 = arith.constant 0 : index
    %8 = vector.load %arg4[%c0_6, %c0_7] : memref<128x128xf32, #tpu.memory_space<vmem>>, vector<128x128xf32>
    %cst_8 = arith.constant dense<0.000000e+00> : vector<8x128xf32>
    %9 = tpu.matmul %7, %8, %cst_8 {dimension_numbers = #tpu.dot_dimension_numbers<[1], [0], [0], [1], [0, 0, 1, 1], [], []>} : vector<8x128xf32>, vector<128x128xf32>, vector<8x128xf32> -> vector<8x128xf32>
    %c0_9 = arith.constant 0 : index
    %c0_10 = arith.constant 0 : index
    %10 = vector.load %arg5[%c0_9, %c0_10] : memref<1x128xf32, #tpu.memory_space<vmem>>, vector<1x128xf32>
    %11 = vector.broadcast %10 : vector<1x128xf32> to vector<8x128xf32>
    %12 = arith.addf %9, %11 : vector<8x128xf32>
    %cst_11 = arith.constant 0.000000e+00 : f32
    %13 = vector.broadcast %cst_11 : f32 to vector<8x128xf32>
    %14 = arith.maximumf %12, %13 : vector<8x128xf32>
    %c0_12 = arith.constant 0 : index
    %c0_13 = arith.constant 0 : index
    %15 = vector.load %arg6[%c0_12, %c0_13] : memref<128x128xf32, #tpu.memory_space<vmem>>, vector<128x128xf32>
    %cst_14 = arith.constant dense<0.000000e+00> : vector<8x128xf32>
    %16 = tpu.matmul %14, %15, %cst_14 {dimension_numbers = #tpu.dot_dimension_numbers<[1], [0], [0], [1], [0, 0, 1, 1], [], []>} : vector<8x128xf32>, vector<128x128xf32>, vector<8x128xf32> -> vector<8x128xf32>
    %c0_15 = arith.constant 0 : index
    %c0_16 = arith.constant 0 : index
    %17 = vector.load %arg7[%c0_15, %c0_16] : memref<1x128xf32, #tpu.memory_space<vmem>>, vector<1x128xf32>
    %18 = vector.broadcast %17 : vector<1x128xf32> to vector<8x128xf32>
    %19 = arith.addf %16, %18 : vector<8x128xf32>
    %20 = tpu.iota {dimensions = array<i32: 1>} : vector<8x128xi32>
    %c7_i32 = arith.constant 7 : i32
    %21 = vector.broadcast %c7_i32 : i32 to vector<8x128xi32>
    %22 = arith.cmpi slt, %20, %21 : vector<8x128xi32>
    %cst_17 = arith.constant -1.000000e+30 : f32
    %23 = vector.broadcast %cst_17 : f32 to vector<8x128xf32>
    %24 = arith.select %22, %19, %23 : vector<8x128xi1>, vector<8x128xf32>
    %cst_18 = arith.constant dense<0xFF800000> : vector<8xf32>
    %25 = vector.multi_reduction <maximumf>, %24, %cst_18 [1] : vector<8x128xf32> to vector<8xf32>
    %26 = vector.shape_cast %25 : vector<8xf32> to vector<8x1xf32>
    %27 = vector.broadcast %26 : vector<8x1xf32> to vector<8x128xf32>
    %28 = arith.subf %24, %27 : vector<8x128xf32>
    %29 = math.exp %28 : vector<8x128xf32>
    %cst_19 = arith.constant dense<0.000000e+00> : vector<8xf32>
    %30 = vector.multi_reduction <add>, %29, %cst_19 [1] : vector<8x128xf32> to vector<8xf32>
    %31 = vector.shape_cast %30 : vector<8xf32> to vector<8x1xf32>
    %32 = tpu.reciprocal %31 : vector<8x1xf32> -> vector<8x1xf32>
    %33 = vector.broadcast %32 : vector<8x1xf32> to vector<8x128xf32>
    %34 = arith.mulf %29, %33 : vector<8x128xf32>
    %c7_i32_20 = arith.constant 7 : i32
    %35 = vector.broadcast %c7_i32_20 : i32 to vector<8x128xi32>
    %36 = arith.cmpi eq, %20, %35 : vector<8x128xi32>
    %37 = arith.select %36, %19, %34 : vector<8x128xi1>, vector<8x128xf32>
    %c0_21 = arith.constant 0 : index
    %c0_22 = arith.constant 0 : index
    %38 = vector.load %arg8[%c0_21, %c0_22] : memref<8x128xf32, #tpu.memory_space<vmem>>, vector<8x128xf32>
    tpu.vector_store %arg8[%c0_21, %c0_22], %37 {strides = array<i32>} : memref<8x128xf32, #tpu.memory_space<vmem>>, vector<8x128xf32>,
    return
  }
  func.func @transform_0(%arg0: i32) -> (i32, i32) {
    %c0_i32 = arith.constant 0 : i32
    %c0_i32_0 = arith.constant 0 : i32
    return %arg0, %c0_i32 : i32, i32
  }
  func.func @transform_1(%arg0: i32) -> (i32, i32) {
    %c0_i32 = arith.constant 0 : i32
    %c0_i32_0 = arith.constant 0 : i32
    %c0_i32_1 = arith.constant 0 : i32
    return %c0_i32, %c0_i32_0 : i32, i32
  }
  func.func @transform_2(%arg0: i32) -> (i32, i32) {
    %c0_i32 = arith.constant 0 : i32
    %c0_i32_0 = arith.constant 0 : i32
    %c0_i32_1 = arith.constant 0 : i32
    return %c0_i32, %c0_i32_0 : i32, i32
  }
  func.func @transform_3(%arg0: i32) -> (i32, i32) {
    %c0_i32 = arith.constant 0 : i32
    %c0_i32_0 = arith.constant 0 : i32
    %c0_i32_1 = arith.constant 0 : i32
    return %c0_i32, %c0_i32_0 : i32, i32
  }
  func.func @transform_4(%arg0: i32) -> (i32, i32) {
    %c0_i32 = arith.constant 0 : i32
    %c0_i32_0 = arith.constant 0 : i32
    %c0_i32_1 = arith.constant 0 : i32
    return %c0_i32, %c0_i32_0 : i32, i32
  }
  func.func @transform_5(%arg0: i32) -> (i32, i32) {
    %c0_i32 = arith.constant 0 : i32
    %c0_i32_0 = arith.constant 0 : i32
    %c0_i32_1 = arith.constant 0 : i32
    return %c0_i32, %c0_i32_0 : i32, i32
  }
  func.func @transform_6(%arg0: i32) -> (i32, i32) {
    %c0_i32 = arith.constant 0 : i32
    %c0_i32_0 = arith.constant 0 : i32
    %c0_i32_1 = arith.constant 0 : i32
    return %c0_i32, %c0_i32_0 : i32, i32
  }
  func.func @transform_7(%arg0: i32) -> (i32, i32) {
    %c0_i32 = arith.constant 0 : i32
    %c0_i32_0 = arith.constant 0 : i32
    return %arg0, %c0_i32 : i32, i32
  }
}

</mosaic_0001>

<bundles_post_ra>
// kernel: tpu_custom_call.1
= control target key start
LH: loop header
LB: loop body
LE: loop exit
PB: predicated region body
PF: predicated region fallthrough
CT: control target
= control target key end

     0   :  { %12 = vsyncpa [#allocation3], 0  ;;  %s472_s0 = inlined_call_operand.hbm [shape: f32[8,42], index: 0, kind: input, shape index: {}]   ;;  %s473_s1 = inlined_call_operand.hbm [shape: f32[42,128], index: 1, kind: input, shape index: {}]   ;;  %s474_s2 = inlined_call_operand.vmem [shape: f32[1,128], index: 2, kind: input, shape index: {}]   ;;  %s475_s3 = inlined_call_operand.hbm [shape: f32[128,128], index: 3, kind: input, shape index: {}]   ;;  %s476_s4 = inlined_call_operand.vmem [shape: f32[1,128], index: 4, kind: input, shape index: {}]   ;;  %s477_s5 = inlined_call_operand.hbm [shape: f32[128,128], index: 5, kind: input, shape index: {}]   ;;  %s478_s6 = inlined_call_operand.vmem [shape: f32[1,128], index: 6, kind: input, shape index: {}]   ;;  %s479_s7 = inlined_call_operand.hbm [shape: f32[8,128], index: 7, kind: output, shape index: {}]  }
   0x1   :  { %13 = vsyncpa [#allocation6], 0 }
   0x2   :  { %14 = vsyncpa [#allocation9], 0  ;;  %s31_s26 = sshll.u32 %s473_s1, 4  ;;  %s32_s26 = int_to_ptr.hbm [resolvable:$true] %s31_s26 }
   0x3   :  { %15 = vsyncpa [#allocation4], 0  ;;  %s401_s27 = smov [#allocation5]   ;;  %s21_s8 = sshll.u32 %s472_s0, 4  ;;  %s22_s8 = int_to_ptr.hbm [resolvable:$true] %s21_s8 }
   0x4   :  { %s33_s28 = sshll.u32 %s401_s27, 4  ;;  %s402_s9 = smov 128   ;;  %s34_s28 = int_to_ptr.vmem [resolvable:$true] %s33_s28 }
   0x5   :  { %s403_s10 = smov 8   ;;  %s404_s11 = smov [#allocation2]  }
   0x6   :  { %39 = dma.hbm_to_vmem [thread:$0]  %s32_s26, 768, %s34_s28, [#allocation6], %s402_s9, %s402_s9, %s403_s10  }
   0x7   :  { %s23_s12 = sshll.u32 %s404_s11, 4  ;;  %s46_s15 = sshll.u32 %s475_s3, 4  ;;  %s24_s12 = int_to_ptr.vmem [resolvable:$true] %s23_s12  ;;  %s47_s15 = int_to_ptr.hbm [resolvable:$true] %s46_s15 }
   0x8   :  { %26 = dma.hbm_to_vmem [thread:$0]  %s22_s8, 128, %s24_s12, [#allocation3]  }
   0x9   :  { %s61_s17 = sshll.u32 %s477_s5, 4  ;;  %s405_s18 = smov [#allocation7]   ;;  %s62_s17 = int_to_ptr.hbm [resolvable:$true] %s61_s17 }
   0xa   :  { %s48_s19 = sshll.u32 %s405_s18, 4  ;;  %s406_s0 = smov [#allocation8]   ;;  %s49_s19 = int_to_ptr.vmem [resolvable:$true] %s48_s19 }
   0xb   :  { %54 = dma.hbm_to_vmem [thread:$0]  %s47_s15, 2048, %s49_s19, [#allocation6], %s402_s9, %s402_s9, %s403_s10  }
   0xc   :  { %s63_s20 = sshll.u32 %s406_s0, 4  ;;  %s64_s20 = int_to_ptr.vmem [resolvable:$true] %s63_s20 }
   0xd   :  { %69 = dma.hbm_to_vmem [thread:$0]  %s62_s17, 2048, %s64_s20, [#allocation9], %s402_s9, %s402_s9, %s403_s10  }
   0xe   :  { %393 = dma.done.wait [#allocation3], 128  }
   0xf   :  { %394 = vsyncadd [#allocation3], 4294967168 }
  0x10   :  { %395 = dma.done.wait [#allocation6], 2816  }
  0x11   :  { %396 = vsyncadd [#allocation6], 4294964480 }
  0x12   :  { %397 = dma.done.wait [#allocation9], 2048  }
  0x13   :  { %398 = vsyncadd [#allocation9], 4294965248  ;;  %vm103_vm0 = vcmask 1041408   ;;  %v94_v0 = vld [vmem:[#allocation5 + $0x28] sm:$0x3]  ;;  %v93_v1 = vld [vmem:[#allocation5 + $0x20] sm:$0xff]  ;;  %v209_v47 = vlaneseq }
  0x14   :  { %257 = vmatpush.msk.msra.mxu0 %vm103_vm0, %v94_v0  ;;  %v92_v2 = vld [vmem:[#allocation5 + $0x18] sm:$0xff]  ;;  %v143_v3 = vld [vmem:[#allocation7 + $0x78] sm:$0xff]  ;;  %v142_v4 = vld [vmem:[#allocation7 + $0x70] sm:$0xff]  ;;  %vm99_vm1 = vcmask 343040   ;;  %s245_s26 = sshll.u32 %s479_s7, 4  ;;  %s246_s26 = int_to_ptr.hbm [resolvable:$true] %s245_s26 }
  0x15   :  { %148 = vmatpush.msra.mxu1 %v143_v3  ;;  %v91_v5 = vld [vmem:[#allocation5 + $0x10] sm:$0xff]  ;;  %v141_v6 = vld [vmem:[#allocation7 + $0x68] sm:$0xff]  ;;  %v90_v7 = vld [vmem:[#allocation5 + $0x8] sm:$0xff]  ;;  %v210_v48 = vand.u32 127, %v209_v47 }
  0x16   :  { %118 = vmatpush.msra.mxu0 %v93_v1  ;;  %v140_v8 = vld [vmem:[#allocation7 + $0x60] sm:$0xff]  ;;  %v89_v9 = vld [vmem:[#allocation5] sm:$0xff]  ;;  %v139_v10 = vld [vmem:[#allocation7 + $0x58] sm:$0xff] }
  0x17   :  { %149 = vmatpush.msra.mxu1 %v142_v4  ;;  %v88_v11 = vld [vmem:[#allocation2] sm:$0xff]  ;;  %v138_v12 = vld [vmem:[#allocation7 + $0x50] sm:$0xff]  ;;  %v136_v14 = vld [vmem:[#allocation7 + $0x40] sm:$0xff]  ;;  %vm211_vm2 = vcmp.lt.s32.totalorder %v210_v48, 7  ;;  %vm235_vm7 = vcmp.eq.s32.totalorder %v210_v48, 7 }
  0x18   :  { %119 = vmatpush.msra.mxu0 %v92_v2  ;;  %v137_v13 = vld [vmem:[#allocation7 + $0x48] sm:$0xff]  ;;  %v135_v15 = vld [vmem:[#allocation7 + $0x38] sm:$0xff]  ;;  %v134_v16 = vld [vmem:[#allocation7 + $0x30] sm:$0xff] }
  0x19   :  { %150 = vmatpush.msra.mxu1 %v141_v6  ;;  %v133_v17 = vld [vmem:[#allocation7 + $0x28] sm:$0xff]  ;;  %v132_v18 = vld [vmem:[#allocation7 + $0x20] sm:$0xff]  ;;  %v131_v19 = vld [vmem:[#allocation7 + $0x18] sm:$0xff] }
  0x1a   :  { %120 = vmatpush.msra.mxu0 %v91_v5  ;;  %v130_v20 = vld [vmem:[#allocation7 + $0x10] sm:$0xff]  ;;  %v129_v21 = vld [vmem:[#allocation7 + $0x8] sm:$0xff]  ;;  %v128_v22 = vld [vmem:[#allocation7] sm:$0xff] }
  0x1b   :  { %151 = vmatpush.msra.mxu1 %v140_v8  ;;  %v184_v23 = vld [vmem:[#allocation8 + $0x78] sm:$0xff]  ;;  %v183_v24 = vld [vmem:[#allocation8 + $0x70] sm:$0xff]  ;;  %v182_v25 = vld [vmem:[#allocation8 + $0x68] sm:$0xff] }
  0x1c   :  { %121 = vmatpush.msra.mxu0 %v90_v7  ;;  %189 = vmatpush.msra.mxu2 %v184_v23  ;;  %v181_v26 = vld [vmem:[#allocation8 + $0x60] sm:$0xff]  ;;  %v180_v27 = vld [vmem:[#allocation8 + $0x58] sm:$0xff]  ;;  %v179_v28 = vld [vmem:[#allocation8 + $0x50] sm:$0xff] }
  0x1d   :  { %152 = vmatpush.msra.mxu1 %v139_v10  ;;  %v178_v29 = vld [vmem:[#allocation8 + $0x48] sm:$0xff]  ;;  %v177_v30 = vld [vmem:[#allocation8 + $0x40] sm:$0xff]  ;;  %v176_v31 = vld [vmem:[#allocation8 + $0x38] sm:$0xff] }
  0x1e   :  { %122 = vmatpush.msra.mxu0 %v89_v9  ;;  %190 = vmatpush.msra.mxu2 %v183_v24  ;;  %v175_v32 = vld [vmem:[#allocation8 + $0x30] sm:$0xff]  ;;  %v174_v33 = vld [vmem:[#allocation8 + $0x28] sm:$0xff]  ;;  %v173_v34 = vld [vmem:[#allocation8 + $0x20] sm:$0xff] }
  0x1f   :  { %258 = vmatmul.msk.f32.vlgmr.msra.gmra.mxu0 %vm99_vm1, %v88_v11  ;;  %153 = vmatpush.msra.mxu1 %v138_v12  ;;  %v172_v35 = vld [vmem:[#allocation8 + $0x18] sm:$0xff]  ;;  %v266_v36 = vld [vmem:[%s474_s2] ss:$0 sm:$0xff]  ;;  %v171_v40 = vld [vmem:[#allocation8 + $0x10] sm:$0xff] }
  0x20   :  { %191 = vmatpush.msra.mxu2 %v182_v25  ;;  %v170_v41 = vld [vmem:[#allocation8 + $0x8] sm:$0xff]  ;;  %v169_v42 = vld [vmem:[#allocation8] sm:$0xff] }
  0x21   :  { %154 = vmatpush.msra.mxu1 %v137_v13  ;;  %v267_v43 = vld [vmem:[%s476_s4] ss:$0 sm:$0xff]  ;;  %s407_s4 = smov [#allocation10]  }
  0x22   :  { %192 = vmatpush.msra.mxu2 %v181_v26  ;;  %v268_v49 = vld [vmem:[%s478_s6] ss:$0 sm:$0xff]  ;;  %s243_s6 = sshll.u32 %s407_s4, 4  ;;  %s244_s6 = int_to_ptr.vmem [resolvable:$true] %s243_s6 }
  0x23   :  { %155 = vmatpush.msra.mxu1 %v136_v14 }
  0x24   :  { %193 = vmatpush.msra.mxu2 %v180_v27 }
  0x25   :  { %156 = vmatpush.msra.mxu1 %v135_v15 }
  0x26   :  { %194 = vmatpush.msra.mxu2 %v179_v28 }
  0x27   :  { %157 = vmatpush.msra.mxu1 %v134_v16 }
  0x28   :  { %195 = vmatpush.msra.mxu2 %v178_v29 }
  0x29   :  { %158 = vmatpush.msra.mxu1 %v133_v17 }
  0x2a   :  { %196 = vmatpush.msra.mxu2 %v177_v30 }
  0x2b   :  { %159 = vmatpush.msra.mxu1 %v132_v18 }
  0x2c   :  { %197 = vmatpush.msra.mxu2 %v176_v31 }
  0x2d   :  { %160 = vmatpush.msra.mxu1 %v131_v19 }
  0x2e   :  { %198 = vmatpush.msra.mxu2 %v175_v32 }
  0x2f   :  { %161 = vmatpush.msra.mxu1 %v130_v20 }
  0x30   :  { %199 = vmatpush.msra.mxu2 %v174_v33 }
  0x31   :  { %162 = vmatpush.msra.mxu1 %v129_v21 }
  0x32   :  { %200 = vmatpush.msra.mxu2 %v173_v34 }
  0x33   :  { %163 = vmatpush.msra.mxu1 %v128_v22 }
  0x34   :  { %201 = vmatpush.msra.mxu2 %v172_v35 }
  0x36   :  { %202 = vmatpush.msra.mxu2 %v171_v40 }
  0x38   :  { %203 = vmatpush.msra.mxu2 %v170_v41 }
  0x3a   :  { %204 = vmatpush.msra.mxu2 %v169_v42 }
  0x9c   :  { %v124_v37 = vpop.f32.mrf.mxu0 }
  0x9d   :  { %v125_v38 = vadd.f32 %v266_v36, %v124_v37 }
  0x9f   :  { %v127_v39 = vmax.f32 %v125_v38, 0.0 }
  0xa1   :  { %164 = vmatmul.f32.vlgmr.msra.gmra.mxu1 %v127_v39 }
 0x11e   :  { %v165_v44 = vpop.f32.mrf.mxu1 }
 0x11f   :  { %v166_v45 = vadd.f32 %v267_v43, %v165_v44 }
 0x121   :  { %v168_v46 = vmax.f32 %v166_v45, 0.0 }
 0x123   :  { %205 = vmatmul.f32.vlgmr.msra.gmra.mxu2 %v168_v46 }
 0x1a6   :  { %v206_v50 = vpop.f32.mrf.mxu2 }
 0x1a7   :  { %v207_v51 = vadd.f32 %v268_v49, %v206_v50 }
 0x1a9   :  { %v212_v52 = vsel %vm211_vm2, %v207_v51, -1e+30 }
 0x1aa   :  { %213 = vmax.xlane.f32.xlu0 %v212_v52 }
 0x21d   :  { %v214_v53 = vpop.xlane.xlu0 %213 }
 0x21e   :  { %v215_v54 = vsub.f32 %v212_v52, %v214_v53 }
 0x220   :  { %v216_v55 = vmul.f32 1.442695, %v215_v54 }
 0x222   :  { %269 = vpow2.f32 %v216_v55 }
 0x228   :  { %v270_v56 = vpop.eup %269 }
 0x229   :  { %218 = vadd.xlane.f32.xlu0 %v270_v56 }
 0x29c   :  { %v219_v57 = vpop.xlane.xlu0 %218 }
 0x29d   :  { %271 = vrcp.f32 %v219_v57  ;;  %v231_v61 = vand.u32 2147483648, %v219_v57  ;;  %v229_v63 = vand.u32 2147483647, %v219_v57  ;;  %vm225_vm4 = vweird.f32 %v219_v57 }
 0x29f   :  { %v232_v1 = vor.u32 1.1754944e-38, %v231_v61  ;;  %vm230_vm6 = vcmp.eq.f32.partialorder %v229_v63, 8.507059e+37 }
 0x2a3   :  { %v272_v58 = vpop.eup %271 }
 0x2a4   :  { %v221_v59 = vmul.f32 %v272_v58, %v219_v57  ;;  %vm226_vm3 = vweird.f32 %v272_v58 }
 0x2a5   :  { %vm227_vm5 = vmor %vm225_vm4, %vm226_vm3 }
 0x2a6   :  { %v222_v60 = vsub.f32 1.0, %v221_v59 }
 0x2a8   :  { %v223_v62 = vmul.f32 %v272_v58, %v222_v60 }
 0x2aa   :  { %v224_v0 = vadd.f32 %v272_v58, %v223_v62 }
 0x2ac   :  { %v228_v2 = vsel %vm227_vm5, %v272_v58, %v224_v0 }
 0x2ad   :  { %v233_v3 = vsel %vm230_vm6, %v232_v1, %v228_v2 }
 0x2ae   :  { %v234_v4 = vmul.f32 %v270_v56, %v233_v3 }
 0x2b0   :  { %v236_v5 = vsel %vm235_vm7, %v207_v51, %v234_v4 }
 0x2b1   :  { %237 = vst [vmem:[#allocation10] sm:$0xff] %v236_v5 }
 0x2b2   :  { %248 = dma.vmem_to_hbm [thread:$0]  %s244_s6, 128, %s246_s26, [#allocation4]  }
 0x2b3   :  { %399 = dma.done.wait [#allocation4], 128  }
 0x2b4   :  { %400 = vsyncadd [#allocation4], 4294967168 }
 0x2b5   :  { %253 = vsyncpa [#allocation3], 1 }
 0x2b6   :  { %254 = vsyncpa [#allocation6], 1 }
 0x2b7   :  { %255 = vsyncpa [#allocation9], 1 }
 0x2b8   :  { %256 = vsyncpa [#allocation4], 1 }

</bundles_post_ra>
